<compile_context>
chip_gen: v5e
topology: v5e:2x2
jax: 0.10.0
libtpu: 0.0.40
codegen_flags: <defaults>
</compile_context>

<pallas_src>
import jax
import jax.numpy as jnp
from jax.experimental import pallas as pl
from jax.experimental.pallas import tpu as pltpu


# ----------------------------- tiling helpers -------------------------------

def _round_up(x, m):
    return (x + m - 1) // m * m


def _pick_tile(dim, candidates):
    for c in candidates:
        if c <= dim and dim % c == 0:
            return c
    return dim


def _device_vmem_bytes():
    try:
        info = pltpu.get_tpu_info()
        cap = getattr(info, "vmem_capacity_bytes", None)
        if cap:
            return int(cap)
    except Exception:
        pass
    return 64 * 1024 * 1024            # conservative (v7x-sized) fallback


def _tiling_config():
    vmem = _device_vmem_bytes()
    if vmem >= 100 * 1024 * 1024:      # v5e / v6e / v5p: 128 MiB VMEM
        return dict(tm_pref=512, tj_candidates=(512, 256, 128),
                    vmem_limit=100 * 1024 * 1024)
    # v7x: 64 MiB physical VMEM -- smaller tiles, leave headroom
    return dict(tm_pref=256, tj_candidates=(256, 128),
                vmem_limit=48 * 1024 * 1024)


def _choose_token_tile(T, tm_pref):
    if T <= tm_pref:
        tm = _round_up(T, 8)
        padded_T = tm
    else:
        tm = tm_pref
        padded_T = _round_up(T, tm)
    # megacore: prefer >= 2 token tiles when a single tile would cover the batch
    if padded_T // tm < 2 and tm >= 16 and tm % 16 == 0:
        tm //= 2
    return tm, padded_T


# ----------------------------- fused MoE kernel ------------------------------

def fused_moe_experts(x, wg, wu, wd, wt_t, eff_flat, *, tm, tj, vmem_limit):
    """Grid = (token tile i, intermediate tile j, expert e)  [e innermost].

    Experts 0..n_shared-1 are the shared expert's virtual slices (weight 1.0);
    the rest are routed experts with top-k weights * routed_scaling_factor
    already folded into wt_t.  The f32 VMEM accumulator is resident across
    (j, e); inactive (tile, expert) steps have their weight/wt DMA elided via
    the scalar-prefetched effective-id table and their compute skipped.
    """
    Tp, H = x.shape
    E_total, _, inter = wg.shape
    nj = inter // tj
    grid = (Tp // tm, nj, E_total)

    def kernel(eff_ref, x_ref, wg_ref, wu_ref, wd_ref, wt_ref, o_ref, acc_ref):
        i = pl.program_id(0)
        j = pl.program_id(1)
        e = pl.program_id(2)

        @pl.when(jnp.logical_and(j == 0, e == 0))
        def _init():
            acc_ref[...] = jnp.zeros_like(acc_ref)

        # Expert e is active for this token tile iff its effective id is itself.
        @pl.when(eff_ref[i * E_total + e] == e)
        def _compute():
            x_blk = x_ref[...]
            g = jnp.dot(x_blk, wg_ref[...], preferred_element_type=jnp.float32)
            u = jnp.dot(x_blk, wu_ref[...], preferred_element_type=jnp.float32)
            # f32 epilogue (v5e has no bf16 VPU); routing weight folded into the
            # (tm, tj) intermediate instead of scaling the (tm, H) output.
            h = (jax.nn.silu(g) * u * wt_ref[...]).astype(wd_ref.dtype)
            acc_ref[...] += jnp.dot(h, wd_ref[...],
                                    preferred_element_type=jnp.float32)

        @pl.when(jnp.logical_and(j == pl.num_programs(1) - 1,
                                 e == pl.num_programs(2) - 1))
        def _finalize():
            o_ref[...] = acc_ref[...].astype(o_ref.dtype)

    # Data-dependent expert index: inactive (i, e) repeats the previous block
    # index -> Pallas elides the DMA (values unused: compute is gated off).
    def gate_up_map(i, j, e, eff):
        return (eff[i * E_total + e], 0, j)

    def down_map(i, j, e, eff):
        return (eff[i * E_total + e], j, 0)

    def wt_map(i, j, e, eff):
        return (eff[i * E_total + e], i, 0)

    return pl.pallas_call(
        kernel,
        out_shape=jax.ShapeDtypeStruct((Tp, H), x.dtype),
        grid_spec=pltpu.PrefetchScalarGridSpec(
            num_scalar_prefetch=1,                       # eff table in SMEM
            grid=grid,
            in_specs=[
                pl.BlockSpec((tm, H), lambda i, j, e, eff: (i, 0)),
                pl.BlockSpec((pl.Squeezed(), H, tj), gate_up_map),
                pl.BlockSpec((pl.Squeezed(), H, tj), gate_up_map),
                pl.BlockSpec((pl.Squeezed(), tj, H), down_map),
                pl.BlockSpec((pl.Squeezed(), tm, 1), wt_map),
            ],
            out_specs=pl.BlockSpec((tm, H), lambda i, j, e, eff: (i, 0)),
            scratch_shapes=[pltpu.VMEM((tm, H), jnp.float32)],
        ),
        compiler_params=pltpu.CompilerParams(
            dimension_semantics=("parallel", "arbitrary", "arbitrary"),
            vmem_limit_bytes=vmem_limit,
        ),
    )(eff_flat, x, wg, wu, wd, wt_t)


# ------------------------- routing glue (plain JAX) ---------------------------

def grouped_topk(router_logits, correction_bias, *, top_k, n_group,
                 topk_group, renormalize, scoring_func):
    """vLLM FusedMoE grouped_topk (noaux_tc / DeepSeek-style)."""
    logits = router_logits.astype(jnp.float32)
    if scoring_func == "sigmoid":
        scores = jax.nn.sigmoid(logits)
    else:
        scores = jax.nn.softmax(logits, axis=-1)
    T, E = scores.shape
    epg = E // n_group

    if correction_bias is not None:
        scores_for_choice = scores + correction_bias[None, :].astype(jnp.float32)
        grp = scores_for_choice.reshape(T, n_group, epg)
        group_scores = jnp.sum(jax.lax.top_k(grp, 2)[0], axis=-1)
    else:
        scores_for_choice = scores
        group_scores = jnp.max(scores.reshape(T, n_group, epg), axis=-1)

    group_idx = jax.lax.top_k(group_scores, topk_group)[1]          # (T, kg)
    group_mask = jnp.zeros((T, n_group), jnp.float32).at[
        jnp.arange(T)[:, None], group_idx].set(1.0)
    score_mask = jnp.repeat(group_mask, epg, axis=1)                # (T, E)
    tmp_scores = jnp.where(score_mask > 0, scores_for_choice, -jnp.inf)

    if correction_bias is not None:
        topk_ids = jax.lax.top_k(tmp_scores, top_k)[1]
        topk_w = jnp.take_along_axis(scores, topk_ids, axis=1)
    else:
        topk_w, topk_ids = jax.lax.top_k(tmp_scores, top_k)

    if renormalize:
        topk_w = topk_w / jnp.sum(topk_w, axis=-1, keepdims=True)
    return topk_w, topk_ids


# -------------------- load-time weight fusion (once) -------------------------

def prepare_dots1_moe_weights(params, cfg):
    """One-time fusion: split the shared Dots1MLP (intermediate = n_shared * I)
    into n_shared virtual experts of intermediate size I (SwiGLU decomposes
    exactly over the intermediate dim) and concatenate them in front of the
    routed experts.  Do this at weight-load time, not per forward."""
    H = cfg["hidden_size"]
    I = cfg["moe_intermediate_size"]
    n_shared = cfg["n_shared_experts"] or 0
    wg_e, wu_e, wd_e = params["expert_wg"], params["expert_wu"], params["expert_wd"]
    if n_shared:
        sh_wg = params["shared_wg"].reshape(H, n_shared, I).transpose(1, 0, 2)
        sh_wu = params["shared_wu"].reshape(H, n_shared, I).transpose(1, 0, 2)
        sh_wd = params["shared_wd"].reshape(n_shared, I, H)
        all_wg = jnp.concatenate([sh_wg, wg_e], axis=0)
        all_wu = jnp.concatenate([sh_wu, wu_e], axis=0)
        all_wd = jnp.concatenate([sh_wd, wd_e], axis=0)
    else:
        all_wg, all_wu, all_wd = wg_e, wu_e, wd_e
    return dict(all_wg=all_wg, all_wu=all_wu, all_wd=all_wd,
                gate_w=params["gate_w"],
                e_score_correction_bias=params["e_score_correction_bias"])


# ------------------------------- forward --------------------------------------

def dots1_moe_forward(hidden_states, fused, cfg, tile_cfg=None):
    T, H = hidden_states.shape
    x = hidden_states.reshape(-1, H)
    E = cfg["n_routed_experts"]
    n_shared = cfg["n_shared_experts"] or 0
    E_total = E + n_shared
    I = cfg["moe_intermediate_size"]

    if tile_cfg is None:
        tile_cfg = _tiling_config()
    tm, padded_T = _choose_token_tile(T, tile_cfg["tm_pref"])
    tj = _pick_tile(I, tile_cfg["tj_candidates"])

    # Router gate: tiny [T, E] matmul -- plain XLA, fuses with the routing glue.
    router_logits = jnp.dot(x.astype(jnp.float32), fused["gate_w"])
    topk_w, topk_ids = grouped_topk(
        router_logits, fused["e_score_correction_bias"],
        top_k=cfg["num_experts_per_tok"], n_group=cfg["n_group"],
        topk_group=cfg["topk_group"], renormalize=cfg["norm_topk_prob"],
        scoring_func=cfg["scoring_func"])

    # Dense [T, E_total] routing weights: 1.0 for the shared virtual experts,
    # top-k weights * routed_scaling_factor for routed experts.
    wt_routed = jnp.zeros((T, E), jnp.float32).at[
        jnp.arange(T)[:, None], topk_ids].add(topk_w)
    wt_routed = wt_routed * cfg["routed_scaling_factor"]
    if n_shared:
        wt = jnp.concatenate(
            [jnp.ones((T, n_shared), jnp.float32), wt_routed], axis=1)
    else:
        wt = wt_routed

    # Pad tokens to the tile size (zero routing weight -> zero contribution).
    xb = x.astype(fused["all_wg"].dtype)
    if padded_T > T:
        xb = jnp.pad(xb, ((0, padded_T - T), (0, 0)))
        wt = jnp.pad(wt, ((0, padded_T - T), (0, 0)))

    nt = padded_T // tm
    # Per-(token-tile, expert) activity.  An expert whose (renormalized) top-k
    # weight is exactly 0 is skipped -- its contribution would be 0 anyway.
    active = (wt.reshape(nt, tm, E_total) != 0.0).any(axis=1)
    active = active.at[:, 0].set(True)            # keep eff well-defined
    ids = jnp.where(active, jnp.arange(E_total)[None, :], -1)
    # Effective expert id = last active expert <= e (so inactive steps repeat
    # the previous block index and their weight DMA is elided).  Flattened 1D
    # to avoid 2D SMEM (8,128) padding blow-up.
    eff_flat = jax.lax.cummax(ids, axis=1).astype(jnp.int32).reshape(-1)

    wt_t = wt.T.reshape(E_total, padded_T, 1)     # per-expert weight column

    out = fused_moe_experts(
        xb, fused["all_wg"], fused["all_wu"], fused["all_wd"], wt_t, eff_flat,
        tm=tm, tj=tj, vmem_limit=tile_cfg["vmem_limit"])
    return out[:T].astype(hidden_states.dtype).reshape(T, H)


# --------------------------- pure-JAX reference -------------------------------

def _mlp_ref(x, wg, wu, wd):
    g = x @ wg.astype(jnp.float32)
    u = x @ wu.astype(jnp.float32)
    return (jax.nn.silu(g) * u) @ wd.astype(jnp.float32)


def dots1_moe_reference(hidden_states, params, cfg):
    x = hidden_states.astype(jnp.float32)
    T = x.shape[0]
    E = cfg["n_routed_experts"]
    shared = _mlp_ref(x, params["shared_wg"], params["shared_wu"],
                      params["shared_wd"])
    logits = x @ params["gate_w"]
    topk_w, topk_ids = grouped_topk(
        logits, params["e_score_correction_bias"],
        top_k=cfg["num_experts_per_tok"], n_group=cfg["n_group"],
        topk_group=cfg["topk_group"], renormalize=cfg["norm_topk_prob"],
        scoring_func=cfg["scoring_func"])
    wt = jnp.zeros((T, E), jnp.float32).at[
        jnp.arange(T)[:, None], topk_ids].add(topk_w)
    routed = jnp.zeros_like(x)
    for e in range(E):
        routed += wt[:, e:e + 1] * _mlp_ref(
            x, params["expert_wg"][e], params["expert_wu"][e],
            params["expert_wd"][e])
    return routed * cfg["routed_scaling_factor"] + shared


# --------------------------------- main ---------------------------------------

if __name__ == "__main__":
    cfg = dict(
        hidden_size=64,
        moe_intermediate_size=32,
        n_routed_experts=8,
        n_group=4,
        topk_group=2,
        num_experts_per_tok=2,
        n_shared_experts=2,
        routed_scaling_factor=2.5,
        norm_topk_prob=True,
        scoring_func="sigmoid",
    )
    T = 8
    H = cfg["hidden_size"]
    I = cfg["moe_intermediate_size"]
    E = cfg["n_routed_experts"]
    sI = I * cfg["n_shared_experts"]

    key = jax.random.PRNGKey(0)
    ks = jax.random.split(key, 9)
    dt = jnp.bfloat16
    params = {
        "shared_wg": (0.05 * jax.random.normal(ks[0], (H, sI), jnp.float32)).astype(dt),
        "shared_wu": (0.05 * jax.random.normal(ks[1], (H, sI), jnp.float32)).astype(dt),
        "shared_wd": (0.05 * jax.random.normal(ks[2], (sI, H), jnp.float32)).astype(dt),
        "gate_w": 0.05 * jax.random.normal(ks[3], (H, E), jnp.float32),
        "e_score_correction_bias": 0.05 * jax.random.normal(ks[4], (E,), jnp.float32),
        "expert_wg": (0.05 * jax.random.normal(ks[5], (E, H, I), jnp.float32)).astype(dt),
        "expert_wu": (0.05 * jax.random.normal(ks[6], (E, H, I), jnp.float32)).astype(dt),
        "expert_wd": (0.05 * jax.random.normal(ks[7], (E, I, H), jnp.float32)).astype(dt),
    }
    hidden_states = jax.random.normal(ks[8], (T, H), jnp.float32).astype(dt)

    fused = prepare_dots1_moe_weights(params, cfg)   # load-time weight fusion

    out = dots1_moe_forward(hidden_states, fused, cfg)
    jax.block_until_ready(out)
    assert out.shape == (T, H)
    assert bool(jnp.isfinite(out.astype(jnp.float32)).all())

    ref = dots1_moe_reference(hidden_states, params, cfg)
    max_err = float(jnp.max(jnp.abs(out.astype(jnp.float32) - ref)))
    assert max_err < 3e-2, f"kernel/reference mismatch: max abs err {max_err}"

    print("KERNEL_OK")
</pallas_src>

<mosaic_0001>
module attributes {stable_mosaic.version = 11 : i64} {
  func.func @kernel(%arg0: i32, %arg1: i32, %arg2: i32, %arg3: memref<10xi32, #tpu.memory_space<smem>>, %arg4: memref<8x64xbf16, #tpu.memory_space<vmem>>, %arg5: memref<1x64x32xbf16, #tpu.memory_space<vmem>>, %arg6: memref<1x64x32xbf16, #tpu.memory_space<vmem>>, %arg7: memref<1x32x64xbf16, #tpu.memory_space<vmem>>, %arg8: memref<1x8x1xf32, #tpu.memory_space<vmem>>, %arg9: memref<8x64xbf16, #tpu.memory_space<vmem>>, %arg10: memref<8x64xf32, #tpu.memory_space<vmem>>) attributes {dimension_semantics = [#tpu.dimension_semantics<parallel>, #tpu.dimension_semantics<arbitrary>, #tpu.dimension_semantics<arbitrary>], iteration_bounds = array<i64: 1, 1, 10>, scalar_prefetch = 1 : i64, scratch_operands = 1 : i64, tpu.core_type = #tpu.core_type<tc>, window_params = [{transform_indices = @transform_0, window_bounds = array<i64: 8, 64>}, {transform_indices = @transform_1, window_bounds = array<i64: 1, 64, 32>}, {transform_indices = @transform_2, window_bounds = array<i64: 1, 64, 32>}, {transform_indices = @transform_3, window_bounds = array<i64: 1, 32, 64>}, {transform_indices = @transform_4, window_bounds = array<i64: 1, 8, 1>}, {transform_indices = @transform_5, window_bounds = array<i64: 8, 64>}]} {
    %c0_i32 = arith.constant 0 : i32
    %0 = arith.cmpi eq, %arg1, %c0_i32 : i32
    %c0_i32_0 = arith.constant 0 : i32
    %1 = arith.cmpi eq, %arg2, %c0_i32_0 : i32
    %2 = arith.andi %0, %1 : i1
    %3 = arith.extui %2 : i1 to i32
    %c0_i32_1 = arith.constant 0 : i32
    %4 = arith.cmpi ne, %3, %c0_i32_1 : i32
    scf.if %4 {
      %cst = arith.constant 0.000000e+00 : f32
      %17 = vector.broadcast %cst : f32 to vector<8x64xf32>
      %c0 = arith.constant 0 : index
      %c0_5 = arith.constant 0 : index
      %18 = vector.load %arg10[%c0, %c0_5] : memref<8x64xf32, #tpu.memory_space<vmem>>, vector<8x64xf32>
      tpu.vector_store %arg10[%c0, %c0_5], %17 {strides = array<i32>} : memref<8x64xf32, #tpu.memory_space<vmem>>, vector<8x64xf32>,
    } else {
    }
    %c10_i32 = arith.constant 10 : i32
    %5 = arith.muli %arg0, %c10_i32 : i32
    %6 = arith.addi %5, %arg2 : i32
    %7 = arith.index_cast %6 : i32 to index
    %8 = memref.load %arg3[%7] : memref<10xi32, #tpu.memory_space<smem>>
    %9 = arith.cmpi eq, %8, %arg2 : i32
    %10 = arith.extui %9 : i1 to i32
    %c0_i32_2 = arith.constant 0 : i32
    %11 = arith.cmpi ne, %10, %c0_i32_2 : i32
    scf.if %11 {
      %c0 = arith.constant 0 : index
      %c0_5 = arith.constant 0 : index
      %17 = vector.load %arg4[%c0, %c0_5] : memref<8x64xbf16, #tpu.memory_space<vmem>>, vector<8x64xbf16>
      %c0_6 = arith.constant 0 : index
      %c0_7 = arith.constant 0 : index
      %c0_8 = arith.constant 0 : index
      %18 = vector.load %arg5[%c0_6, %c0_7, %c0_8] : memref<1x64x32xbf16, #tpu.memory_space<vmem>>, vector<1x64x32xbf16>
      %19 = vector.shape_cast %18 : vector<1x64x32xbf16> to vector<64x32xbf16>
      %cst = arith.constant dense<0.000000e+00> : vector<8x32xf32>
      %20 = tpu.matmul %17, %19, %cst {dimension_numbers = #tpu.dot_dimension_numbers<[1], [0], [0], [1], [0, 0, 1, 1], [], []>} : vector<8x64xbf16>, vector<64x32xbf16>, vector<8x32xf32> -> vector<8x32xf32>
      %c0_9 = arith.constant 0 : index
      %c0_10 = arith.constant 0 : index
      %c0_11 = arith.constant 0 : index
      %21 = vector.load %arg6[%c0_9, %c0_10, %c0_11] : memref<1x64x32xbf16, #tpu.memory_space<vmem>>, vector<1x64x32xbf16>
      %22 = vector.shape_cast %21 : vector<1x64x32xbf16> to vector<64x32xbf16>
      %cst_12 = arith.constant dense<0.000000e+00> : vector<8x32xf32>
      %23 = tpu.matmul %17, %22, %cst_12 {dimension_numbers = #tpu.dot_dimension_numbers<[1], [0], [0], [1], [0, 0, 1, 1], [], []>} : vector<8x64xbf16>, vector<64x32xbf16>, vector<8x32xf32> -> vector<8x32xf32>
      %24 = arith.negf %20 : vector<8x32xf32>
      %25 = math.exp %24 : vector<8x32xf32>
      %cst_13 = arith.constant 1.000000e+00 : f32
      %26 = vector.broadcast %cst_13 : f32 to vector<8x32xf32>
      %27 = arith.addf %26, %25 : vector<8x32xf32>
      %28 = arith.divf %26, %27 : vector<8x32xf32>
      %29 = arith.mulf %20, %28 : vector<8x32xf32>
      %30 = arith.mulf %29, %23 : vector<8x32xf32>
      %c0_14 = arith.constant 0 : index
      %c0_15 = arith.constant 0 : index
      %c0_16 = arith.constant 0 : index
      %31 = vector.load %arg8[%c0_14, %c0_15, %c0_16] : memref<1x8x1xf32, #tpu.memory_space<vmem>>, vector<1x8x1xf32>
      %32 = vector.shape_cast %31 : vector<1x8x1xf32> to vector<8x1xf32>
      %33 = vector.broadcast %32 : vector<8x1xf32> to vector<8x32xf32>
      %34 = arith.mulf %30, %33 : vector<8x32xf32>
      %35 = arith.truncf %34 : vector<8x32xf32> to vector<8x32xbf16>
      %c0_17 = arith.constant 0 : index
      %c0_18 = arith.constant 0 : index
      %36 = vector.load %arg10[%c0_17, %c0_18] : memref<8x64xf32, #tpu.memory_space<vmem>>, vector<8x64xf32>
      %c0_19 = arith.constant 0 : index
      %c0_20 = arith.constant 0 : index
      %c0_21 = arith.constant 0 : index
      %37 = vector.load %arg7[%c0_19, %c0_20, %c0_21] : memref<1x32x64xbf16, #tpu.memory_space<vmem>>, vector<1x32x64xbf16>
      %38 = vector.shape_cast %37 : vector<1x32x64xbf16> to vector<32x64xbf16>
      %cst_22 = arith.constant dense<0.000000e+00> : vector<8x64xf32>
      %39 = tpu.matmul %35, %38, %cst_22 {dimension_numbers = #tpu.dot_dimension_numbers<[1], [0], [0], [1], [0, 0, 1, 1], [], []>} : vector<8x32xbf16>, vector<32x64xbf16>, vector<8x64xf32> -> vector<8x64xf32>
      %40 = arith.addf %36, %39 : vector<8x64xf32>
      %c0_23 = arith.constant 0 : index
      %c0_24 = arith.constant 0 : index
      %41 = vector.load %arg10[%c0_23, %c0_24] : memref<8x64xf32, #tpu.memory_space<vmem>>, vector<8x64xf32>
      tpu.vector_store %arg10[%c0_23, %c0_24], %40 {strides = array<i32>} : memref<8x64xf32, #tpu.memory_space<vmem>>, vector<8x64xf32>,
    } else {
    }
    %c0_i32_3 = arith.constant 0 : i32
    %12 = arith.cmpi eq, %arg1, %c0_i32_3 : i32
    %c9_i32 = arith.constant 9 : i32
    %13 = arith.cmpi eq, %arg2, %c9_i32 : i32
    %14 = arith.andi %12, %13 : i1
    %15 = arith.extui %14 : i1 to i32
    %c0_i32_4 = arith.constant 0 : i32
    %16 = arith.cmpi ne, %15, %c0_i32_4 : i32
    scf.if %16 {
      %c0 = arith.constant 0 : index
      %c0_5 = arith.constant 0 : index
      %17 = vector.load %arg10[%c0, %c0_5] : memref<8x64xf32, #tpu.memory_space<vmem>>, vector<8x64xf32>
      %18 = arith.truncf %17 : vector<8x64xf32> to vector<8x64xbf16>
      %c0_6 = arith.constant 0 : index
      %c0_7 = arith.constant 0 : index
      %19 = vector.load %arg9[%c0_6, %c0_7] : memref<8x64xbf16, #tpu.memory_space<vmem>>, vector<8x64xbf16>
      tpu.vector_store %arg9[%c0_6, %c0_7], %18 {strides = array<i32>} : memref<8x64xbf16, #tpu.memory_space<vmem>>, vector<8x64xbf16>,
    } else {
    }
    return
  }
  func.func @transform_0(%arg0: i32, %arg1: i32, %arg2: i32, %arg3: memref<10xi32, #tpu.memory_space<smem>>) -> (i32, i32) {
    %c0_i32 = arith.constant 0 : i32
    %c0_i32_0 = arith.constant 0 : i32
    return %arg0, %c0_i32 : i32, i32
  }
  func.func @transform_1(%arg0: i32, %arg1: i32, %arg2: i32, %arg3: memref<10xi32, #tpu.memory_space<smem>>) -> (i32, i32, i32) {
    %c10_i32 = arith.constant 10 : i32
    %0 = arith.muli %arg0, %c10_i32 : i32
    %1 = arith.addi %0, %arg2 : i32
    %2 = arith.index_cast %1 : i32 to index
    %3 = memref.load %arg3[%2] : memref<10xi32, #tpu.memory_space<smem>>
    %c0_i32 = arith.constant 0 : i32
    %c0_i32_0 = arith.constant 0 : i32
    return %3, %c0_i32, %arg1 : i32, i32, i32
  }
  func.func @transform_2(%arg0: i32, %arg1: i32, %arg2: i32, %arg3: memref<10xi32, #tpu.memory_space<smem>>) -> (i32, i32, i32) {
    %c10_i32 = arith.constant 10 : i32
    %0 = arith.muli %arg0, %c10_i32 : i32
    %1 = arith.addi %0, %arg2 : i32
    %2 = arith.index_cast %1 : i32 to index
    %3 = memref.load %arg3[%2] : memref<10xi32, #tpu.memory_space<smem>>
    %c0_i32 = arith.constant 0 : i32
    %c0_i32_0 = arith.constant 0 : i32
    return %3, %c0_i32, %arg1 : i32, i32, i32
  }
  func.func @transform_3(%arg0: i32, %arg1: i32, %arg2: i32, %arg3: memref<10xi32, #tpu.memory_space<smem>>) -> (i32, i32, i32) {
    %c10_i32 = arith.constant 10 : i32
    %0 = arith.muli %arg0, %c10_i32 : i32
    %1 = arith.addi %0, %arg2 : i32
    %2 = arith.index_cast %1 : i32 to index
    %3 = memref.load %arg3[%2] : memref<10xi32, #tpu.memory_space<smem>>
    %c0_i32 = arith.constant 0 : i32
    %c0_i32_0 = arith.constant 0 : i32
    return %3, %arg1, %c0_i32 : i32, i32, i32
  }
  func.func @transform_4(%arg0: i32, %arg1: i32, %arg2: i32, %arg3: memref<10xi32, #tpu.memory_space<smem>>) -> (i32, i32, i32) {
    %c10_i32 = arith.constant 10 : i32
    %0 = arith.muli %arg0, %c10_i32 : i32
    %1 = arith.addi %0, %arg2 : i32
    %2 = arith.index_cast %1 : i32 to index
    %3 = memref.load %arg3[%2] : memref<10xi32, #tpu.memory_space<smem>>
    %c0_i32 = arith.constant 0 : i32
    %c0_i32_0 = arith.constant 0 : i32
    return %3, %arg0, %c0_i32 : i32, i32, i32
  }
  func.func @transform_5(%arg0: i32, %arg1: i32, %arg2: i32, %arg3: memref<10xi32, #tpu.memory_space<smem>>) -> (i32, i32) {
    %c0_i32 = arith.constant 0 : i32
    %c0_i32_0 = arith.constant 0 : i32
    return %arg0, %c0_i32 : i32, i32
  }
}

</mosaic_0001>

<bundles_post_ra>
// kernel: tpu_custom_call.1
= control target key start
LH: loop header
LB: loop body
LE: loop exit
PB: predicated region body
PF: predicated region fallthrough
CT: control target
= control target key end

     0   :  { %s959_s24 = smov [#allocation4]   ;;  %s1080_s0 = inlined_call_operand.vmem [shape: s32[10], index: 0, kind: input, shape index: {}]   ;;  %s1081_s1 = inlined_call_operand.vmem [shape: bf16[8,64], index: 1, kind: input, shape index: {}]   ;;  %s1082_s2 = inlined_call_operand.vmem [shape: bf16[10,64,32], index: 2, kind: input, shape index: {}]   ;;  %s1083_s3 = inlined_call_operand.vmem [shape: bf16[10,64,32], index: 3, kind: input, shape index: {}]   ;;  %s1084_s4 = inlined_call_operand.vmem [shape: bf16[10,32,64], index: 4, kind: input, shape index: {}]   ;;  %s1085_s5 = inlined_call_operand.vmem [shape: f32[10,8,1], index: 5, kind: input, shape index: {}]   ;;  %s1086_s6 = inlined_call_operand.hbm [shape: bf16[8,64], index: 6, kind: output, shape index: {}]  }
   0x1   :  { %s12_s23 = sshll.u32 %s1080_s0, 4  ;;  %s13_s23 = int_to_ptr.vmem [resolvable:$true] %s12_s23 }
   0x2   :  { %15 = dma.vmem_to_smem %s13_s23, 16, %s959_s24, [#allocation3] }
   0x3   :  { %941 = dma.done.wait [#allocation3], 16 }
   0x4   :  { %942 = vsyncadd [#allocation3], 4294967280 }
   0x5   :  { %18 = sfence }
   0x6   :  { %19 = vsyncpa [#allocation6], 0  ;;  %s1001_s25 = smov 0   ;;  %s1003_s26 = smov 0  }
   0x7   :  { %s1005_s27 = smov 0  }
   0x8 LB: > { %s772_s0 = sadd.s32 4294967295, %s957_s27   ;;  %s37_s28 = sadd.s32 1, %s953_s26  ;;  %s957_s27 = sphi %s1005_s27, %s25_s27   ;;  %s953_s26 = sphi %s1003_s26, %s1088_s26   ;;  %s949_s25 = sphi %s1001_s25, %s1087_s25  }
   0x9   : > { %p38_p0 = scmp.ge.s32.totalorder %s37_s28, 10  ;;  %p776_p1 = scmp.ge.s32.totalorder %s957_s27, 1 }
   0xa   : > { %p324_p2 = scmp.lt.s32.totalorder %s957_s27, 11 }
   0xb   : > { %s1090_s28 = smov (%p38_p0, %s37_s28), 0 }
   0xc   : > { %p325_p3 = pnand %p776_p1, %p324_p2 }
   0xd   : > { %s396_s29 = sld [smem:[#allocation4 + %s949_s25]] (!%p325_p3)  ;;  %p453_p4 = scmp.eq.s32.totalorder (!%p325_p3), %s949_s25, 0 }
   0xe   : > { %328 = sbr.rel (%p325_p3) target bundleno = 374 (0x176), region = 40  ;;  %s410_s30 = sld [smem:[#allocation4 + %s949_s25]] (!%p325_p3) }
   0xf   : > { %s424_s7 = sld [smem:[#allocation4 + %s949_s25]] (!%p325_p3) }
  0x10   : > { %s440_s8 = sld [smem:[#allocation4 + %s949_s25]] (!%p325_p3) }
  0x13   : > { %p397_p5 = scmp.lt.s32.totalorder %s396_s29, 9  ;;  %vm458_vm0 = vcmask (%p453_p4), 523264   ;;  %v960_v0 = vmov (%p453_p4), 0.0  }
  0x14   : > { %p411_p6 = scmp.lt.s32.totalorder %s410_s30, 9  ;;  %459 = vst.msk [vmem:[#allocation2] sm:$0xff] (%p453_p4), %vm458_vm0, %v960_v0 }
  0x15   : > { %s1092_s29 = smov (!%p397_p5, %s396_s29), 9  ;;  %p426_p7 = scmp.lt.s32.totalorder %s424_s7, 9 }
  0x16   : > { %s1094_s30 = smov (!%p411_p6, %s410_s30), 9  ;;  %s835_s9 = sshll.u32 %s1092_s29, 5 }
  0x17   : > { %s1030_s12 = scalar_lea.vmem %s1082_s2, %s835_s9  ;;  %s836_s13 = sshll.u32 %s1094_s30, 5 }
  0x18   : > { %s1035_s16 = scalar_lea.vmem %s1083_s3, %s836_s13  ;;  %p441_p8 = scmp.lt.s32.totalorder %s440_s8, 9 }
  0x19   : > { %s1096_s7 = smov (!%p426_p7, %s424_s7), 9  ;;  %457 = sbr.rel (!%p453_p4) target bundleno = 30 (0x1e), region = 44 }
  0x1a   : > { %s1098_s8 = smov (!%p441_p8, %s440_s8), 9  ;;  %s837_s17 = sshll.u32 %s1096_s7, 4 }
  0x1b   : > { %s1040_s20 = scalar_lea.vmem %s1084_s4, %s837_s17  ;;  %s783_s21 = sshll.u32 %s1098_s8, 3 }
  0x1c   : > { %s447_s24 = scalar_lea.vmem %s1085_s5, %s783_s21 }
  0x1e PF: > { %s462_s29 = sld [smem:[#allocation4 + %s949_s25]] }
  0x24   : > { %p785_p9 = scmp.ne.s32.totalorder %s462_s29, %s949_s25 }
  0x26   : > { %466 = sbr.rel (%p785_p9) target bundleno = 361 (0x169), region = 48 }
  0x2b   : > { %v842_v1 = vld [vmem:[%s1030_s12 + $0x18] sm:$0xff]  ;;  %v961_v3 = vmov 0   ;;  %v841_v4 = vld [vmem:[%s1030_s12 + $0x10] sm:$0xff]  ;;  %v583_v6 = vld [vmem:[%s447_s24] sm:$0xff]  ;;  %vm500_vm1 = vcmask 523264   ;;  %vm608_vm6 = vcmask 261120  }
  0x2c   : > { %v846_v2 = vld [vmem:[%s1035_s16 + $0x18] sm:$0xff]  ;;  %884 = vset.pattern.permute.xlu0 %v961_v3  ;;  %508 = vmatpush.bf16.msra.mxu0 %v842_v1  ;;  %v845_v5 = vld [vmem:[%s1035_s16 + $0x10] sm:$0xff]  ;;  %v840_v7 = vld [vmem:[%s1030_s12 + $0x8] sm:$0xff] }
  0x2d   : > { %553 = vmatpush.bf16.msra.mxu1 %v846_v2  ;;  %586 = vperm.xlu0 %884, %v583_v6   ;;  %v844_v8 = vld [vmem:[%s1035_s16 + $0x8] sm:$0xff]  ;;  %v839_v9 = vld [vmem:[%s1030_s12] sm:$0xff] }
  0x2e   : > { %v843_v10 = vld [vmem:[%s1035_s16] sm:$0xff]  ;;  %v848_v12 = vld [vmem:[%s1040_s20 + $0x8] sm:$0xff] }
  0x2f   : > { %v467_v11 = vld [vmem:[%s1081_s1] sm:$0xf]  ;;  %618 = vmatpush.bf16.msra.mxu2 %v848_v12 }
  0x30   : > { %509 = vmatpush.bf16.msra.mxu0 %v841_v4  ;;  %v847_v14 = vld [vmem:[%s1040_s20] sm:$0xff] }
  0x31   : > { %554 = vmatpush.bf16.msra.mxu1 %v845_v5  ;;  %v591_v36 = vld [vmem:[#allocation2] sm:$0xff] }
  0x33   : > { %619 = vmatpush.bf16.msra.mxu2 %v847_v14 }
  0x34   : > { %510 = vmatpush.bf16.msra.mxu0 %v840_v7 }
  0x35   : > { %555 = vmatpush.bf16.msra.mxu1 %v844_v8 }
  0x38   : > { %511 = vmatpush.bf16.msra.mxu0 %v839_v9 }
  0x39   : > { %556 = vmatpush.bf16.msra.mxu1 %v843_v10 }
  0x3b   : > { %802 = vmatmul.msk.bf16.vlgmr.msra.gmra.mxu0 %vm500_vm1, %v467_v11 }
  0x3c   : > { %819 = vmatmul.msk.bf16.vlgmr.msra.gmra.mxu1 %vm500_vm1, %v467_v11 }
  0x9f   : > { %v587_v32 = vpop.permute.xlu0 %586 }
  0xb8   : > { %v513_v13 = vpop.f32.mrf.mxu0 }
  0xb9   : > { %v820_v15 = vmul.f32 -1.442695, %v513_v13  ;;  %v558_v16 = vpop.f32.mrf.mxu1 }
  0xbb   : > { %885 = vpow2.f32 %v820_v15 }
  0xc0   : > { %v515_v17 = vpop.f32.mrf.mxu0 }
  0xc1   : > { %v886_v18 = vpop.eup %885  ;;  %v560_v19 = vpop.f32.mrf.mxu1 }
  0xc2   : > { %v565_v20 = vadd.f32 1.0, %v886_v18 }
  0xc4   : > { %887 = vrcp.f32 %v565_v20  ;;  %v577_v24 = vand.u32 2147483648, %v565_v20  ;;  %v575_v26 = vand.u32 2147483647, %v565_v20  ;;  %vm571_vm3 = vweird.f32 %v565_v20 }
  0xc6   : > { %v578_v28 = vor.u32 1.1754944e-38, %v577_v24  ;;  %vm576_vm5 = vcmp.eq.f32.partialorder %v575_v26, 8.507059e+37 }
  0xca   : > { %v888_v21 = vpop.eup %887 }
  0xcb   : > { %v567_v22 = vmul.f32 %v888_v21, %v565_v20  ;;  %vm572_vm2 = vweird.f32 %v888_v21 }
  0xcc   : > { %vm573_vm4 = vmor %vm571_vm3, %vm572_vm2 }
  0xcd   : > { %v568_v23 = vsub.f32 1.0, %v567_v22 }
  0xcf   : > { %v569_v25 = vmul.f32 %v888_v21, %v568_v23 }
  0xd1   : > { %v570_v27 = vadd.f32 %v888_v21, %v569_v25 }
  0xd3   : > { %v574_v29 = vsel %vm573_vm4, %v888_v21, %v570_v27 }
  0xd4   : > { %v579_v30 = vsel %vm576_vm5, %v578_v28, %v574_v29 }
  0xd5   : > { %v581_v31 = vmul.f32 %v579_v30, %v513_v13 }
  0xd7   : > { %v582_v33 = vmul.f32 %v581_v31, %v558_v16 }
  0xd9   : > { %v589_v34 = vmul.f32 %v587_v32, %v582_v33 }
  0xdb   : > { %v590_v35 = vpack.c.bf16 %v589_v34, %v589_v34 }
  0xdd   : > { %829 = vmatmul.msk.bf16.vlgmr.msra.gmra.mxu2 %vm608_vm6, %v590_v35 }
 0x160   : > { %v621_v37 = vpop.f32.mrf.mxu2 }
 0x161   : > { %v625_v38 = vadd.f32 %v621_v37, %v591_v36 }
 0x163   : > { %626 = vst.msk [vmem:[#allocation2] sm:$0xff] %vm500_vm1, %v625_v38 }
 0x168   : > { %v623_v39 = vpop.f32.mrf.mxu2 }
 0x169 PF: > { %p627_p10 = scmp.eq.s32.totalorder %s949_s25, 9 }
 0x16a   : > { %v632_v40 = vld [vmem:[#allocation2] sm:$0xff] (%p627_p10)  ;;  %vm634_vm7 = vcmask (%p627_p10), 519168  }
 0x16b   : > { %631 = sbr.rel (!%p627_p10) target bundleno = 368 (0x170), region = 52  ;;  %v633_v41 = vpack.c.bf16 (%p627_p10), %v632_v40, %v632_v40 }
 0x16d   : > { %635 = vst.msk [vmem:[#allocation5] sm:$0xf] (%p627_p10), %vm634_vm7, %v633_v41 }
 0x170 PF: > { %p854_p11 = scmp.eq.s32.totalorder %s772_s0, 9  ;;  %s646_s10 = sshll.u32 %s1086_s6, 4  ;;  %s647_s10 = int_to_ptr.hbm [resolvable:$true] %s646_s10 }
 0x171   : > { %s962_s11 = smov [#allocation5]  }
 0x172   : > { %s644_s12 = sshll.u32 %s962_s11, 4  ;;  %s645_s12 = int_to_ptr.vmem [resolvable:$true] %s644_s12 }
 0x173   : > { %851 = dma.vmem_to_hbm [thread:$0]  (%p854_p11), %s645_s12, 64, %s647_s10, [#allocation6]  }
 0x174   : > { %944 = dma.done.wait (%p854_p11), [#allocation6], 64  }
 0x175   : > { %946 = vsyncadd (%p854_p11), [#allocation6], 4294967232 }
 0x176 PF: > { %s25_s27 = sadd.s32 1, %s957_s27   ;;  %s1087_s25 = smov %s953_s26 }
 0x177   : > { %p22_p12 = scmp.ge.s32.totalorder %s25_s27, 12   ;;  %s1088_s26 = smov %s1090_s28 }
 0x179   :  { %24 = sbr.rel (!%p22_p12) target bundleno = 8 (0x8), region = 92 }
 0x17e   :  { %660 = vsyncpa [#allocation6], 1 }
 0x17f   :  { %662 = vsyncpa [#allocation6 + $0x1], 1 }

</bundles_post_ra>
